<compile_context>
chip_gen: v7x
topology: tpu7x:2x2x1
jax: 0.10.0
libtpu: 0.0.40
codegen_flags: <defaults>
</compile_context>

<pallas_src>
import functools

import jax
import jax.numpy as jnp
from jax import lax
from jax.experimental import pallas as pl
from jax.experimental.pallas import tpu as pltpu

KH = 5           # kernel_size = (5, 1)
PAD = 2          # padding     = (2, 0)
POOL = 5         # pool_kernel = pool_stride = (5, 1)
NEG_SLOPE = 0.1  # LeakyReLU negative_slope
BN_EPS = 1e-5    # BatchNorm2d eps


def _convblock_kernel(w_ref, x_ref, p_ref, o_ref, *, N, H, W, Hout):
    # w_ref: (Cout, KH*Cin)      conv weights, im2col form
    # x_ref: (KH*Cin, N*H*W)     im2col'ed (H-padded) input, spatial on lanes
    # p_ref: (Cout, 3)           columns = [conv bias | BN scale | BN shift]
    # o_ref: (Cout, N*Hout*W)    pooled output, spatial on lanes (lane-dense)

    # --- Conv2d with kernel (5,1), pad (2,0): one fused MXU matmul ---
    y = jnp.dot(w_ref[...], x_ref[...],
                preferred_element_type=jnp.float32)          # (Cout, N*H*W)

    p = p_ref[...]                                            # (Cout, 3)
    bias = p[:, 0:1]
    scale = p[:, 1:2]
    shift = p[:, 2:3]

    y = y + bias                                              # conv bias
    # --- LeakyReLU(0.1) ---
    y = jnp.where(y >= 0, y, NEG_SLOPE * y)
    # --- BatchNorm2d (eval): folded running stats, per-channel affine ---
    y = y * scale + shift
    # --- Dropout: identity in eval mode ---
    # TODO(synk): training-mode dropout (stochastic masking) not implemented; eval semantics used.

    # --- MaxPool2d (5,1) stride (5,1): max over POOL consecutive H rows ---
    pooled = []
    for n in range(N):
        for ph in range(Hout):
            base = n * H * W + ph * POOL * W
            m = y[:, base:base + W]                           # (Cout, W)
            for r in range(1, POOL):
                m = jnp.maximum(m, y[:, base + r * W: base + (r + 1) * W])
            pooled.append(m)
    # single full-width store (for the demo shapes this is exactly one vreg)
    o_ref[...] = jnp.concatenate(pooled, axis=1).astype(o_ref.dtype)


def conv_block_2d(x_nchw, weight, bias, gamma, beta, run_mean, run_var):
    """x_nchw: (N, Cin, H, W); weight: (Cout, Cin, KH, 1). Returns NCHW output."""
    N, Cin, H, W = x_nchw.shape
    Cout = weight.shape[0]
    Hout = (H - POOL) // POOL + 1

    # --- wrapper glue (tiny data): pad H, build im2col, fold BN params ---
    xp = jnp.pad(x_nchw.astype(jnp.float32),
                 ((0, 0), (0, 0), (PAD, PAD), (0, 0)))        # (N, Cin, H+2P, W)
    # shifted views stacked: (KH, N, Cin, H, W) -> (KH, Cin, N, H, W) -> (KH*Cin, N*H*W)
    cols = jnp.stack([xp[:, :, kh:kh + H, :] for kh in range(KH)], axis=0)
    x_col = cols.transpose(0, 2, 1, 3, 4).reshape(KH * Cin, N * H * W)

    # (Cout, Cin, KH, 1) -> (Cout, KH, Cin) -> (Cout, KH*Cin), matching x_col rows
    w_flat = jnp.transpose(weight[..., 0], (0, 2, 1)).reshape(
        Cout, KH * Cin).astype(jnp.float32)

    scale = gamma / jnp.sqrt(run_var + BN_EPS)
    shift = beta - run_mean * scale
    params = jnp.stack([bias, scale, shift], axis=1).astype(jnp.float32)  # (Cout, 3)

    kernel = functools.partial(_convblock_kernel, N=N, H=H, W=W, Hout=Hout)

    out = pl.pallas_call(
        kernel,
        out_shape=jax.ShapeDtypeStruct((Cout, N * Hout * W), jnp.float32),
        in_specs=[
            pl.BlockSpec(memory_space=pltpu.MemorySpace.VMEM),
            pl.BlockSpec(memory_space=pltpu.MemorySpace.VMEM),
            pl.BlockSpec(memory_space=pltpu.MemorySpace.VMEM),
        ],
        out_specs=pl.BlockSpec(memory_space=pltpu.MemorySpace.VMEM),
    )(w_flat, x_col, params)

    # (Cout, N*Hout*W) -> (N, Cout, Hout, W)  (tiny post-reshape to NCHW)
    return out.reshape(Cout, N, Hout, W).transpose(1, 0, 2, 3)


def _reference(x, weight, bias, gamma, beta, run_mean, run_var):
    """Pure-JAX reference of the eval-mode forward pass (NCHW)."""
    y = lax.conv_general_dilated(
        x, weight, window_strides=(1, 1), padding=((PAD, PAD), (0, 0)),
        dimension_numbers=("NCHW", "OIHW", "NCHW"))
    y = y + bias[None, :, None, None]
    y = jnp.where(y >= 0, y, NEG_SLOPE * y)
    scale = gamma / jnp.sqrt(run_var + BN_EPS)
    shift = beta - run_mean * scale
    y = y * scale[None, :, None, None] + shift[None, :, None, None]
    y = lax.reduce_window(y, -jnp.inf, lax.max,
                          window_dimensions=(1, 1, POOL, 1),
                          window_strides=(1, 1, POOL, 1),
                          padding="VALID")
    return y


if __name__ == "__main__":
    key = jax.random.PRNGKey(0)
    ks = jax.random.split(key, 7)

    # small shapes implied by the module: N=2, Cin=4, Cout=8, H=20 (pool-divisible), W=16
    N, Cin, Cout, H, W = 2, 4, 8, 20, 16

    x = jax.random.normal(ks[0], (N, Cin, H, W), jnp.float32)
    weight = 0.1 * jax.random.normal(ks[1], (Cout, Cin, KH, 1), jnp.float32)
    bias = 0.1 * jax.random.normal(ks[2], (Cout,), jnp.float32)
    gamma = 1.0 + 0.1 * jax.random.normal(ks[3], (Cout,), jnp.float32)
    beta = 0.1 * jax.random.normal(ks[4], (Cout,), jnp.float32)
    run_mean = 0.1 * jax.random.normal(ks[5], (Cout,), jnp.float32)
    run_var = jnp.abs(jax.random.normal(ks[6], (Cout,), jnp.float32)) + 0.5

    out = conv_block_2d(x, weight, bias, gamma, beta, run_mean, run_var)
    out = jax.block_until_ready(out)

    assert out.shape == (N, Cout, H // POOL, W), out.shape
    ref = _reference(x, weight, bias, gamma, beta, run_mean, run_var)
    assert jnp.allclose(out, ref, atol=1e-4, rtol=1e-4), float(jnp.max(jnp.abs(out - ref)))

    print("KERNEL_OK")
</pallas_src>

<mosaic_0001>
module attributes {stable_mosaic.version = 11 : i64} {
  func.func @_convblock_kernel(%arg0: memref<8x20xf32, #tpu.memory_space<vmem>>, %arg1: memref<20x640xf32, #tpu.memory_space<vmem>>, %arg2: memref<8x3xf32, #tpu.memory_space<vmem>>, %arg3: memref<8x128xf32, #tpu.memory_space<vmem>>) attributes {dimension_semantics = [], scalar_prefetch = 0 : i64, scratch_operands = 0 : i64, tpu.core_type = #tpu.core_type<tc>} {
    %c0 = arith.constant 0 : index
    %c0_0 = arith.constant 0 : index
    %0 = vector.load %arg0[%c0, %c0_0] : memref<8x20xf32, #tpu.memory_space<vmem>>, vector<8x20xf32>
    %c0_1 = arith.constant 0 : index
    %c0_2 = arith.constant 0 : index
    %1 = vector.load %arg1[%c0_1, %c0_2] : memref<20x640xf32, #tpu.memory_space<vmem>>, vector<20x640xf32>
    %cst = arith.constant dense<0.000000e+00> : vector<8x640xf32>
    %2 = tpu.matmul %0, %1, %cst {dimension_numbers = #tpu.dot_dimension_numbers<[1], [0], [0], [1], [0, 0, 1, 1], [], []>} : vector<8x20xf32>, vector<20x640xf32>, vector<8x640xf32> -> vector<8x640xf32>
    %c0_3 = arith.constant 0 : index
    %c0_4 = arith.constant 0 : index
    %3 = vector.load %arg2[%c0_3, %c0_4] : memref<8x3xf32, #tpu.memory_space<vmem>>, vector<8x3xf32>
    %4 = vector.extract_strided_slice %3 {offsets = [0, 0], sizes = [8, 1], strides = [1, 1]} : vector<8x3xf32> to vector<8x1xf32>
    %5 = vector.extract_strided_slice %3 {offsets = [0, 1], sizes = [8, 1], strides = [1, 1]} : vector<8x3xf32> to vector<8x1xf32>
    %6 = vector.extract_strided_slice %3 {offsets = [0, 2], sizes = [8, 1], strides = [1, 1]} : vector<8x3xf32> to vector<8x1xf32>
    %7 = vector.broadcast %4 : vector<8x1xf32> to vector<8x640xf32>
    %8 = arith.addf %2, %7 : vector<8x640xf32>
    %cst_5 = arith.constant 0.000000e+00 : f32
    %9 = vector.broadcast %cst_5 : f32 to vector<8x640xf32>
    %10 = arith.cmpf oge, %8, %9 : vector<8x640xf32>
    %cst_6 = arith.constant 1.000000e-01 : f32
    %11 = vector.broadcast %cst_6 : f32 to vector<8x640xf32>
    %12 = arith.mulf %11, %8 : vector<8x640xf32>
    %13 = arith.select %10, %8, %12 : vector<8x640xi1>, vector<8x640xf32>
    %14 = vector.broadcast %5 : vector<8x1xf32> to vector<8x640xf32>
    %15 = arith.mulf %13, %14 : vector<8x640xf32>
    %16 = vector.broadcast %6 : vector<8x1xf32> to vector<8x640xf32>
    %17 = arith.addf %15, %16 : vector<8x640xf32>
    %18 = vector.extract_strided_slice %17 {offsets = [0, 0], sizes = [8, 16], strides = [1, 1]} : vector<8x640xf32> to vector<8x16xf32>
    %19 = vector.extract_strided_slice %17 {offsets = [0, 16], sizes = [8, 16], strides = [1, 1]} : vector<8x640xf32> to vector<8x16xf32>
    %20 = arith.maximumf %18, %19 : vector<8x16xf32>
    %21 = vector.extract_strided_slice %17 {offsets = [0, 32], sizes = [8, 16], strides = [1, 1]} : vector<8x640xf32> to vector<8x16xf32>
    %22 = arith.maximumf %20, %21 : vector<8x16xf32>
    %23 = vector.extract_strided_slice %17 {offsets = [0, 48], sizes = [8, 16], strides = [1, 1]} : vector<8x640xf32> to vector<8x16xf32>
    %24 = arith.maximumf %22, %23 : vector<8x16xf32>
    %25 = vector.extract_strided_slice %17 {offsets = [0, 64], sizes = [8, 16], strides = [1, 1]} : vector<8x640xf32> to vector<8x16xf32>
    %26 = arith.maximumf %24, %25 : vector<8x16xf32>
    %27 = vector.extract_strided_slice %17 {offsets = [0, 80], sizes = [8, 16], strides = [1, 1]} : vector<8x640xf32> to vector<8x16xf32>
    %28 = vector.extract_strided_slice %17 {offsets = [0, 96], sizes = [8, 16], strides = [1, 1]} : vector<8x640xf32> to vector<8x16xf32>
    %29 = arith.maximumf %27, %28 : vector<8x16xf32>
    %30 = vector.extract_strided_slice %17 {offsets = [0, 112], sizes = [8, 16], strides = [1, 1]} : vector<8x640xf32> to vector<8x16xf32>
    %31 = arith.maximumf %29, %30 : vector<8x16xf32>
    %32 = vector.extract_strided_slice %17 {offsets = [0, 128], sizes = [8, 16], strides = [1, 1]} : vector<8x640xf32> to vector<8x16xf32>
    %33 = arith.maximumf %31, %32 : vector<8x16xf32>
    %34 = vector.extract_strided_slice %17 {offsets = [0, 144], sizes = [8, 16], strides = [1, 1]} : vector<8x640xf32> to vector<8x16xf32>
    %35 = arith.maximumf %33, %34 : vector<8x16xf32>
    %36 = vector.extract_strided_slice %17 {offsets = [0, 160], sizes = [8, 16], strides = [1, 1]} : vector<8x640xf32> to vector<8x16xf32>
    %37 = vector.extract_strided_slice %17 {offsets = [0, 176], sizes = [8, 16], strides = [1, 1]} : vector<8x640xf32> to vector<8x16xf32>
    %38 = arith.maximumf %36, %37 : vector<8x16xf32>
    %39 = vector.extract_strided_slice %17 {offsets = [0, 192], sizes = [8, 16], strides = [1, 1]} : vector<8x640xf32> to vector<8x16xf32>
    %40 = arith.maximumf %38, %39 : vector<8x16xf32>
    %41 = vector.extract_strided_slice %17 {offsets = [0, 208], sizes = [8, 16], strides = [1, 1]} : vector<8x640xf32> to vector<8x16xf32>
    %42 = arith.maximumf %40, %41 : vector<8x16xf32>
    %43 = vector.extract_strided_slice %17 {offsets = [0, 224], sizes = [8, 16], strides = [1, 1]} : vector<8x640xf32> to vector<8x16xf32>
    %44 = arith.maximumf %42, %43 : vector<8x16xf32>
    %45 = vector.extract_strided_slice %17 {offsets = [0, 240], sizes = [8, 16], strides = [1, 1]} : vector<8x640xf32> to vector<8x16xf32>
    %46 = vector.extract_strided_slice %17 {offsets = [0, 256], sizes = [8, 16], strides = [1, 1]} : vector<8x640xf32> to vector<8x16xf32>
    %47 = arith.maximumf %45, %46 : vector<8x16xf32>
    %48 = vector.extract_strided_slice %17 {offsets = [0, 272], sizes = [8, 16], strides = [1, 1]} : vector<8x640xf32> to vector<8x16xf32>
    %49 = arith.maximumf %47, %48 : vector<8x16xf32>
    %50 = vector.extract_strided_slice %17 {offsets = [0, 288], sizes = [8, 16], strides = [1, 1]} : vector<8x640xf32> to vector<8x16xf32>
    %51 = arith.maximumf %49, %50 : vector<8x16xf32>
    %52 = vector.extract_strided_slice %17 {offsets = [0, 304], sizes = [8, 16], strides = [1, 1]} : vector<8x640xf32> to vector<8x16xf32>
    %53 = arith.maximumf %51, %52 : vector<8x16xf32>
    %54 = vector.extract_strided_slice %17 {offsets = [0, 320], sizes = [8, 16], strides = [1, 1]} : vector<8x640xf32> to vector<8x16xf32>
    %55 = vector.extract_strided_slice %17 {offsets = [0, 336], sizes = [8, 16], strides = [1, 1]} : vector<8x640xf32> to vector<8x16xf32>
    %56 = arith.maximumf %54, %55 : vector<8x16xf32>
    %57 = vector.extract_strided_slice %17 {offsets = [0, 352], sizes = [8, 16], strides = [1, 1]} : vector<8x640xf32> to vector<8x16xf32>
    %58 = arith.maximumf %56, %57 : vector<8x16xf32>
    %59 = vector.extract_strided_slice %17 {offsets = [0, 368], sizes = [8, 16], strides = [1, 1]} : vector<8x640xf32> to vector<8x16xf32>
    %60 = arith.maximumf %58, %59 : vector<8x16xf32>
    %61 = vector.extract_strided_slice %17 {offsets = [0, 384], sizes = [8, 16], strides = [1, 1]} : vector<8x640xf32> to vector<8x16xf32>
    %62 = arith.maximumf %60, %61 : vector<8x16xf32>
    %63 = vector.extract_strided_slice %17 {offsets = [0, 400], sizes = [8, 16], strides = [1, 1]} : vector<8x640xf32> to vector<8x16xf32>
    %64 = vector.extract_strided_slice %17 {offsets = [0, 416], sizes = [8, 16], strides = [1, 1]} : vector<8x640xf32> to vector<8x16xf32>
    %65 = arith.maximumf %63, %64 : vector<8x16xf32>
    %66 = vector.extract_strided_slice %17 {offsets = [0, 432], sizes = [8, 16], strides = [1, 1]} : vector<8x640xf32> to vector<8x16xf32>
    %67 = arith.maximumf %65, %66 : vector<8x16xf32>
    %68 = vector.extract_strided_slice %17 {offsets = [0, 448], sizes = [8, 16], strides = [1, 1]} : vector<8x640xf32> to vector<8x16xf32>
    %69 = arith.maximumf %67, %68 : vector<8x16xf32>
    %70 = vector.extract_strided_slice %17 {offsets = [0, 464], sizes = [8, 16], strides = [1, 1]} : vector<8x640xf32> to vector<8x16xf32>
    %71 = arith.maximumf %69, %70 : vector<8x16xf32>
    %72 = vector.extract_strided_slice %17 {offsets = [0, 480], sizes = [8, 16], strides = [1, 1]} : vector<8x640xf32> to vector<8x16xf32>
    %73 = vector.extract_strided_slice %17 {offsets = [0, 496], sizes = [8, 16], strides = [1, 1]} : vector<8x640xf32> to vector<8x16xf32>
    %74 = arith.maximumf %72, %73 : vector<8x16xf32>
    %75 = vector.extract_strided_slice %17 {offsets = [0, 512], sizes = [8, 16], strides = [1, 1]} : vector<8x640xf32> to vector<8x16xf32>
    %76 = arith.maximumf %74, %75 : vector<8x16xf32>
    %77 = vector.extract_strided_slice %17 {offsets = [0, 528], sizes = [8, 16], strides = [1, 1]} : vector<8x640xf32> to vector<8x16xf32>
    %78 = arith.maximumf %76, %77 : vector<8x16xf32>
    %79 = vector.extract_strided_slice %17 {offsets = [0, 544], sizes = [8, 16], strides = [1, 1]} : vector<8x640xf32> to vector<8x16xf32>
    %80 = arith.maximumf %78, %79 : vector<8x16xf32>
    %81 = vector.extract_strided_slice %17 {offsets = [0, 560], sizes = [8, 16], strides = [1, 1]} : vector<8x640xf32> to vector<8x16xf32>
    %82 = vector.extract_strided_slice %17 {offsets = [0, 576], sizes = [8, 16], strides = [1, 1]} : vector<8x640xf32> to vector<8x16xf32>
    %83 = arith.maximumf %81, %82 : vector<8x16xf32>
    %84 = vector.extract_strided_slice %17 {offsets = [0, 592], sizes = [8, 16], strides = [1, 1]} : vector<8x640xf32> to vector<8x16xf32>
    %85 = arith.maximumf %83, %84 : vector<8x16xf32>
    %86 = vector.extract_strided_slice %17 {offsets = [0, 608], sizes = [8, 16], strides = [1, 1]} : vector<8x640xf32> to vector<8x16xf32>
    %87 = arith.maximumf %85, %86 : vector<8x16xf32>
    %88 = vector.extract_strided_slice %17 {offsets = [0, 624], sizes = [8, 16], strides = [1, 1]} : vector<8x640xf32> to vector<8x16xf32>
    %89 = arith.maximumf %87, %88 : vector<8x16xf32>
    %90 = tpu.concatenate %26, %35, %44, %53, %62, %71, %80, %89 in 1 : vector<8x16xf32>, vector<8x16xf32>, vector<8x16xf32>, vector<8x16xf32>, vector<8x16xf32>, vector<8x16xf32>, vector<8x16xf32>, vector<8x16xf32> -> vector<8x128xf32>
    %c0_7 = arith.constant 0 : index
    %c0_8 = arith.constant 0 : index
    %91 = vector.load %arg3[%c0_7, %c0_8] : memref<8x128xf32, #tpu.memory_space<vmem>>, vector<8x128xf32>
    tpu.vector_store %arg3[%c0_7, %c0_8], %90 {strides = array<i32>} : memref<8x128xf32, #tpu.memory_space<vmem>>, vector<8x128xf32>,
    return
  }
}

</mosaic_0001>

<bundles_post_ra>
// kernel: tpu_custom_call.1
= control target key start
LH: loop header
LB: loop body
LE: loop exit
PB: predicated region body
PF: predicated region fallthrough
CT: control target
= control target key end

     0   :  { %8 = vsyncpa [#allocation3], 0  ;;  %s648_s0 = inlined_call_operand.vmem [shape: f32[8,20], index: 0, kind: input, shape index: {}]   ;;  %s649_s1 = inlined_call_operand.hbm [shape: f32[20,640], index: 1, kind: input, shape index: {}]   ;;  %s650_s2 = inlined_call_operand.vmem [shape: f32[8,3], index: 2, kind: input, shape index: {}]   ;;  %s651_s3 = inlined_call_operand.hbm [shape: f32[8,128], index: 3, kind: output, shape index: {}]  }
   0x1   :  { %9 = vsyncpa [#allocation4], 0  ;;  %s554_s12 = smov [#allocation2]   ;;  %s506_s16 = scalar_lea.hbm %s649_s1, 1920 }
   0x2   :  { %s17_s13 = sshll.u32 %s554_s12, 4  ;;  %p507_p0 = scmp.ne.s32.totalorder %s649_s1, %s506_s16  ;;  %s18_s13 = int_to_ptr.vmem [resolvable:$true] %s17_s13 }
   0x3   :  { %p510_p1 = scmp.lt.u32.totalorder %s506_s16, %s649_s1 }
   0x5   :  { %p512_p2 = pnand %p510_p1, %p507_p0 }
   0x7   :  { %515 = shalt.err (!%p512_p2)
}
   0x8   :  { %s516_s21 = scalar_lea.vmem %s18_s13, 1920  ;;  %p521_p4 = scmp.lt.s32.totalorder %s18_s13, %s18_s13 }
   0x9   :  { %p517_p3 = scmp.ne.s32.totalorder %s18_s13, %s516_s21  ;;  %p522_p5 = scmp.lt.s32.totalorder %s516_s21, %s516_s21 }
   0xb   :  { %p523_p6 = por %p522_p5, %p521_p4 }
   0xd   :  { %p524_p7 = pnand %p523_p6, %p517_p3 }
   0xf   :  { %527 = shalt.err (!%p524_p7)
}
  0x10   :  { %s555_s22 = smov 640   ;;  %s556_s23 = smov 40  }
  0x11   :  { %23 = dma.hbm_to_vmem [thread:$0]  %s649_s1, 1920, %s18_s13, [#allocation3], %s555_s22, %s555_s22, %s556_s23  }
  0x12   :  { %550 = dma.done.wait [#allocation3], 1920  }
  0x13   :  { %551 = vsyncadd [#allocation3], 4294965376  ;;  %v557_v0 = vmov 0.0   ;;  %v558_v1 = vmov 0   ;;  %v559_v2 = vmov 2   ;;  %v31_v3 = vld [vmem:[#allocation2 + $0x8] sm:$0xff] }
  0x14   :  { %135 = vmatprep.mubr.f32.mxu0 %v557_v0  ;;  %206 = vmatprep.mubr.f32.mxu1 %v557_v0  ;;  %v36_v4 = vld [vmem:[#allocation2 + $0x30] sm:$0xff]  ;;  %v33_v5 = vld [vmem:[#allocation2 + $0x18] sm:$0xff]  ;;  %v38_v7 = vld [vmem:[#allocation2 + $0x40] sm:$0xff]  ;;  %vm55_vm0 = vcmask 1043456   ;;  %vm51_vm1 = vcmask 162816   ;;  %v560_v24 = vmov 0.0|0.0  }
  0x15   :  { %502 = vset.pattern.permute.xlu0 %v558_v1  ;;  %504 = vset.pattern.permute.xlu1 %v559_v2  ;;  %v477_v6 = vpack.c.bf16 %v36_v4, %v31_v3  ;;  %v30_v8 = vld [vmem:[#allocation2] sm:$0xff]  ;;  %v35_v9 = vld [vmem:[#allocation2 + $0x28] sm:$0xff]  ;;  %v481_v10 = vpack.c.bf16 %v38_v7, %v33_v5  ;;  %v32_v12 = vld [vmem:[#allocation2 + $0x10] sm:$0xff]  ;;  %vm561_vm2 = vmmov 0   ;;  %v562_v26 = vmov 1   ;;  %s565_s29 = smov 80  }
  0x16   :  { %v479_v11 = vpack.c.bf16 %v35_v9, %v30_v8  ;;  %v37_v13 = vld [vmem:[#allocation2 + $0x38] sm:$0xff]  ;;  %v43_v16 = vld [vmem:[#allocation2 + $0x68] sm:$0xf]  ;;  %v34_v17 = vld [vmem:[#allocation2 + $0x20] sm:$0xff]  ;;  %s566_s30 = smov 64   ;;  %vm426_vm8 = vcmask 130048  }
  0x17   :  { %v41_v14 = vld [vmem:[#allocation2 + $0x58] sm:$0xf]  ;;  %478 = vmatprep.subr.bf16.mxu0 %v477_v6  ;;  %v483_v15 = vpack.c.bf16 %v37_v13, %v32_v12  ;;  %482 = vmatprep.subr.bf16.mxu1 %v481_v10  ;;  %v39_v18 = vld [vmem:[#allocation2 + $0x48] sm:$0xff]  ;;  %v40_v19 = vld [vmem:[#allocation2 + $0x50] sm:$0xf]  ;;  %vm428_vm9 = vcmask 261120  }
  0x18   :  { %480 = vmatpush1.bf16.msra.mxu0 %v479_v11  ;;  %v45_v20 = vld [vmem:[%s650_s2] sm:$0xff]  ;;  %v486_v23 = vpack.c.bf16 %v39_v18, %v34_v17  ;;  %v44_v25 = vld [vmem:[#allocation2 + $0x70] sm:$0xf]  ;;  %s564_s2 = smov 96   ;;  %vm430_vm10 = vcmask 392192   ;;  %vm432_vm11 = vcmask 523264  }
  0x19   :  { %484 = vmatpush1.bf16.msra.mxu1 %v483_v15  ;;  %456 = vmatprep.subr.msk.mxu0 %vm55_vm0, %v41_v14  ;;  %v42_v21 = vld [vmem:[#allocation2 + $0x60] sm:$0xf]  ;;  %vm434_vm12 = vcmask 654336   ;;  %vm436_vm13 = vcmask 785408   ;;  %s567_s4 = smov [#allocation5]   ;;  %vm438_vm14 = vcmask 916480  }
  0x1a   :  { %459 = vmatprep.subr.msk.mxu1 %vm55_vm0, %v43_v16  ;;  %v29_v22 = vld [vmem:[%s648_s0] sm:$0xff]  ;;  %48 = vperm.xlu0 %502, %v45_v20   ;;  %s563_s0 = smov 112   ;;  %s447_s5 = sshll.u32 %s567_s4, 4  ;;  %s448_s5 = int_to_ptr.vmem [resolvable:$true] %s447_s5 }
  0x1b   :  { %308 = vperm.xlu1 %504, %v45_v20   ;;  %s528_s6 = scalar_lea.vmem %s448_s5, 128  ;;  %p533_p9 = scmp.lt.s32.totalorder %s448_s5, %s448_s5 }
  0x1c   :  { %457 = vmatpush1.msk.msra.mxu0 %vm55_vm0, %v40_v19  ;;  %p529_p8 = scmp.ne.s32.totalorder %s448_s5, %s528_s6  ;;  %p534_p10 = scmp.lt.s32.totalorder %s528_s6, %s528_s6 }
  0x1d   :  { %460 = vmatpush1.msk.msra.mxu1 %vm55_vm0, %v42_v21  ;;  %458 = vmatmul.mubr.msk.f32.vlgmr.msra.gmra.mrb[0].mxu0 %vm51_vm1, %v29_v22 }
  0x1e   :  { %461 = vmatmul.mubr.msk.f32.vlgmr.msra.gmra.mrb[0].mxu1 %vm51_vm1, %v29_v22  ;;  %485 = vmatprep.subr.bf16.mxu0 %v560_v24  ;;  %p535_p11 = por %p534_p10, %p533_p9 }
  0x1f   :  { %487 = vmatpush3.bf16.msra.mxu0 %v486_v23  ;;  %474 = vmatprep.mubr.msk.f32.mxu0 %vm561_vm2, %v557_v0 }
  0x20   :  { %472 = vmatprep.subr.mxu0 %v557_v0  ;;  %503 = vset.pattern.permute.xlu0 %v562_v26  ;;  %p536_p12 = pnand %p535_p11, %p529_p8 }
  0x21   :  { %299 = vperm.xlu0 %503, %v45_v20  }
  0x23   :  { %473 = vmatpush3.msk.msra.mxu0 %vm55_vm0, %v44_v25 }
  0x24   :  { %475 = vmatmul.mubr.msk.f32.vlgmr.msra.gmra.mrb[2].mxu0 %vm51_vm1, %v29_v22 }
  0x25   :  { %505 = vset.pattern.permute.xlu0 %v559_v2 }
  0x99   :  { %v49_v27 = vpop.permute.xlu0 %48 }
  0x9a   :  { %v309_v39 = vpop.permute.xlu1 %308 }
  0xa0   :  { %v300_v35 = vpop.permute.xlu0 %299 }
  0xf0   :  { %v137_v28 = vpop.f32.mrb[0].mxu0 }
  0xf1   :  { %v138_v29 = vadd.f32 %v137_v28, %v49_v27  ;;  %v208_v30 = vpop.f32.mrb[0].mxu1  ;;  %v139_v31 = vpop.f32.mrb[1].mxu0 }
  0xf2   :  { %v209_v32 = vadd.f32 %v208_v30, %v49_v27  ;;  %v210_v33 = vpop.f32.mrb[1].mxu1  ;;  %v140_v38 = vadd.f32 %v139_v31, %v49_v27 }
  0xf3   :  { %vm283_vm3 = vcmp.ge.f32.partialorder %v138_v29, 0.0  ;;  %v288_v34 = vmul.f32 0.1, %v138_v29  ;;  %v211_v47 = vadd.f32 %v210_v33, %v49_v27 }
  0xf4   :  { %vm285_vm4 = vcmp.ge.f32.partialorder %v209_v32, 0.0  ;;  %v290_v36 = vmul.f32 0.1, %v209_v32  ;;  %v289_v46 = vmul.f32 0.1, %v140_v38  ;;  %vm284_vm5 = vcmp.ge.f32.partialorder %v140_v38, 0.0 }
  0xf5   :  { %v293_v37 = vsel %vm283_vm3, %v138_v29, %v288_v34  ;;  %v291_v50 = vmul.f32 0.1, %v211_v47  ;;  %vm286_vm6 = vcmp.ge.f32.partialorder %v211_v47, 0.0 }
  0xf6   :  { %v295_v40 = vsel %vm285_vm4, %v209_v32, %v290_v36  ;;  %v302_v41 = vmul.f32 %v300_v35, %v293_v37  ;;  %v294_v49 = vsel %vm284_vm5, %v140_v38, %v289_v46 }
  0xf7   :  { %v304_v42 = vmul.f32 %v300_v35, %v295_v40  ;;  %v279_v43 = vpop.f32.mrb[2].mxu0  ;;  %v303_v52 = vmul.f32 %v300_v35, %v294_v49  ;;  %v296_v53 = vsel %vm286_vm6, %v211_v47, %v291_v50 }
  0xf8   :  { %v311_v44 = vadd.f32 %v309_v39, %v302_v41  ;;  %v476_v45 = vpop.f32.mrb[3].mxu0  ;;  %v280_v51 = vadd.f32 %v279_v43, %v49_v27  ;;  %v305_v55 = vmul.f32 %v300_v35, %v296_v53 }
  0xf9   :  { %v313_v48 = vadd.f32 %v309_v39, %v304_v42  ;;  %v617_v56 = vadd.f32 %v309_v39, %v303_v52 }
  0xfa   :  { %317 = vrot.lane.b32.xlu1 %v311_v44, %s563_s0  ;;  %v292_v54 = vmul.f32 0.1, %v280_v51  ;;  %vm287_vm7 = vcmp.ge.f32.partialorder %v280_v51, 0.0  ;;  %v314_v58 = vadd.f32 %v309_v39, %v305_v55 }
  0xfb   :  { %353 = vrot.lane.b32.xlu0 %v313_v48, %s563_s0 }
  0xfc   :  { %v297_v57 = vsel %vm287_vm7, %v280_v51, %v292_v54 }
  0xfd   :  { %v306_v59 = vmul.f32 %v300_v35, %v297_v57 }
  0xfe   :  { %321 = vrot.lane.b32.xlu1 %v311_v44, %s564_s2 }
  0xff   :  { %357 = vrot.lane.b32.xlu0 %v313_v48, %s564_s2  ;;  %v315_v60 = vadd.f32 %v309_v39, %v306_v59 }
 0x102   :  { %361 = vrot.lane.b32.xlu1 %v313_v48, %s565_s29 }
 0x103   :  { %365 = vrot.lane.b32.xlu0 %v313_v48, %s566_s30 }
 0x106   :  { %334 = vrot.lane.b32.xlu1 %v617_v56, %s565_s29 }
 0x107   :  { %338 = vrot.lane.b32.xlu0 %v617_v56, %s566_s30 }
 0x10a   :  { %377 = vrot.lane.b32.xlu1 %v314_v58, %s563_s0 }
 0x10b   :  { %381 = vrot.lane.b32.xlu0 %v314_v58, %s564_s2 }
 0x10e   :  { %385 = vrot.lane.b32.xlu1 %v314_v58, %s565_s29 }
 0x10f   :  { %391 = vrot.lane.b32.xlu0 %v315_v60, %s564_s2 }
 0x112   :  { %403 = vrot.lane.b32.xlu1 %v315_v60, %s563_s0 }
 0x113   :  { %395 = vrot.lane.b32.xlu0 %v315_v60, %s565_s29 }
 0x116   :  { %373 = vrot.lane.b32.xlu1 %v314_v58, %s566_s30 }
 0x117   :  { %342 = vrot.lane.b32.xlu0 %v617_v56, %s563_s0 }
 0x11a   :  { %399 = vrot.lane.b32.xlu1 %v315_v60, %s566_s30 }
 0x11b   :  { %325 = vrot.lane.b32.xlu0 %v311_v44, %s565_s29 }
 0x11e   :  { %346 = vrot.lane.b32.xlu1 %v617_v56, %s564_s2 }
 0x122   :  { %329 = vrot.lane.b32.xlu1 %v311_v44, %s566_s30 }
 0x16c   :  { %v318_v61 = vpop.permute.xlu1 %317 }
 0x16d   :  { %v354_v62 = vpop.permute.xlu0 %353  ;;  %v320_v6 = vmax.f32 %v311_v44, %v318_v61 }
 0x16e   :  { %v369_v63 = vmax.f32 %v313_v48, %v354_v62  ;;  %v356_v1 = vmax.f32 %v617_v56, %v354_v62 }
 0x170   :  { %v322_v0 = vpop.permute.xlu1 %321 }
 0x171   :  { %v358_v2 = vpop.permute.xlu0 %357  ;;  %v324_v10 = vmax.f32 %v320_v6, %v322_v0 }
 0x172   :  { %v370_v3 = vmax.f32 %v369_v63, %v358_v2  ;;  %v360_v4 = vmax.f32 %v356_v1, %v358_v2 }
 0x174   :  { %v362_v5 = vpop.permute.xlu1 %361 }
 0x175   :  { %v366_v7 = vpop.permute.xlu0 %365  ;;  %v364_v8 = vmax.f32 %v360_v4, %v362_v5  ;;  %v371_v9 = vmax.f32 %v370_v3, %v362_v5 }
 0x177   :  { %v368_v11 = vmax.f32 %v364_v8, %v366_v7 }
 0x178   :  { %v335_v12 = vpop.permute.xlu1 %334 }
 0x179   :  { %v339_v13 = vpop.permute.xlu0 %338  ;;  %v337_v14 = vmax.f32 %v324_v10, %v335_v12  ;;  %415 = vrot.lane.b32.xlu1 %v368_v11, %s566_s30 }
 0x17b   :  { %v341_v15 = vmax.f32 %v337_v14, %v339_v13 }
 0x17c   :  { %v378_v16 = vpop.permute.xlu1 %377 }
 0x17d   :  { %v382_v17 = vpop.permute.xlu0 %381  ;;  %411 = vrot.lane.b32.xlu0 %v341_v15, %s566_s30  ;;  %v380_v18 = vmax.f32 %v314_v58, %v378_v16 }
 0x17f   :  { %v384_v22 = vmax.f32 %v380_v18, %v382_v17 }
 0x180   :  { %v386_v19 = vpop.permute.xlu1 %385 }
 0x181   :  { %v392_v20 = vpop.permute.xlu0 %391  ;;  %v388_v27 = vmax.f32 %v384_v22, %v386_v19 }
 0x182   :  { %v394_v21 = vmax.f32 %v380_v18, %v392_v20 }
 0x184   :  { %v404_v23 = vpop.permute.xlu1 %403 }
 0x185   :  { %v396_v24 = vpop.permute.xlu0 %395  ;;  %v406_v25 = vmax.f32 %v315_v60, %v404_v23 }
 0x186   :  { %v398_v26 = vmax.f32 %v394_v21, %v396_v24 }
 0x187   :  { %v407_v28 = vmax.f32 %v406_v25, %v392_v20 }
 0x188   :  { %v374_v29 = vpop.permute.xlu1 %373 }
 0x189   :  { %v376_v30 = vmax.f32 %v371_v9, %v374_v29  ;;  %v389_v31 = vmax.f32 %v388_v27, %v374_v29  ;;  %v408_v32 = vmax.f32 %v407_v28, %v396_v24  ;;  %v343_v33 = vpop.permute.xlu0 %342 }
 0x18a   :  { %v345_v37 = vmax.f32 %v617_v56, %v343_v33 }
 0x18b   :  { %419 = vrot.lane.b32.xlu0 %v389_v31, %s566_s30 }
 0x18c   :  { %v400_v34 = vpop.permute.xlu1 %399 }
 0x18d   :  { %v402_v35 = vmax.f32 %v398_v26, %v400_v34  ;;  %v409_v36 = vmax.f32 %v408_v32, %v400_v34  ;;  %v326_v42 = vpop.permute.xlu0 %325 }
 0x18e   :  { %v328_v44 = vmax.f32 %v324_v10, %v326_v42 }
 0x18f   :  { %423 = vrot.lane.b32.xlu1 %v409_v36, %s566_s30 }
 0x190   :  { %v347_v38 = vpop.permute.xlu1 %346 }
 0x191   :  { %v349_v39 = vmax.f32 %v345_v37, %v347_v38 }
 0x193   :  { %v350_v40 = vmax.f32 %v349_v39, %v335_v12 }
 0x194   :  { %v330_v43 = vpop.permute.xlu1 %329 }
 0x195   :  { %v351_v41 = vmax.f32 %v350_v40, %v339_v13  ;;  %v332_v45 = vmax.f32 %v328_v44, %v330_v43 }
 0x1eb   :  { %v416_v48 = vpop.permute.xlu1 %415 }
 0x1ef   :  { %v412_v46 = vpop.permute.xlu0 %411 }
 0x1f0   :  { %v427_v47 = vsel %vm426_vm8, %v332_v45, %v412_v46 }
 0x1f1   :  { %v429_v49 = vsel %vm428_vm9, %v427_v47, %v351_v41 }
 0x1f2   :  { %v431_v50 = vsel %vm430_vm10, %v429_v49, %v416_v48 }
 0x1f3   :  { %v433_v51 = vsel %vm432_vm11, %v431_v50, %v376_v30 }
 0x1fd   :  { %v420_v52 = vpop.permute.xlu0 %419 }
 0x1fe   :  { %v435_v53 = vsel %vm434_vm12, %v433_v51, %v420_v52 }
 0x1ff   :  { %v437_v54 = vsel %vm436_vm13, %v435_v53, %v402_v35 }
 0x201   :  { %v424_v55 = vpop.permute.xlu1 %423 }
 0x202   :  { %v439_v56 = vsel %vm438_vm14, %v437_v54, %v424_v55 }
 0x203   :  { %440 = vst [vmem:[#allocation5] sm:$0xff] %v439_v56 }
 0x204   :  { %539 = shalt.err (!%p536_p12)
}
 0x205   :  { %s540_s9 = scalar_lea.hbm %s651_s3, 128 }
 0x206   :  { %p541_p13 = scmp.ne.s32.totalorder %s651_s3, %s540_s9  ;;  %p544_p0 = scmp.lt.u32.totalorder %s540_s9, %s651_s3 }
 0x208   :  { %p546_p1 = pnand %p544_p0, %p541_p13 }
 0x20a   :  { %549 = shalt.err (!%p546_p1)
}
 0x20b   :  { %450 = dma.vmem_to_hbm [thread:$0]  %s448_s5, 128, %s651_s3, [#allocation4]  }
 0x20c   :  { %552 = dma.done.wait [#allocation4], 128  }
 0x20d   :  { %553 = vsyncadd [#allocation4], 4294967168 }
 0x20e   :  { %454 = vsyncpa [#allocation3], 1 }
 0x20f   :  { %455 = vsyncpa [#allocation4], 1 }

</bundles_post_ra>
